<compile_context>
chip_gen: v6e
topology: v6e:2x2x1
jax: 0.10.0
libtpu: 0.0.40
codegen_flags: <defaults>
</compile_context>

<pallas_src>
import jax
import jax.numpy as jnp
from jax.experimental import pallas as pl
from jax.experimental.pallas import tpu as pltpu


def _round_up(x, m):
    return ((x + m - 1) // m) * m


def _prelu(x, alpha):
    # PyTorch nn.PReLU() default: one learnable scalar alpha (init 0.25)
    return jnp.where(x >= 0, x, alpha * x)


# ---------------------------------------------------------------------------
# Fast path: whole MLP fused into one kernel, weights VMEM-resident.
# ---------------------------------------------------------------------------
def _ffn_tail(h, sc, w2_ref, b2_ref, w3_ref, b3_ref, alpha_ref, out_ref):
    h = _prelu(h, alpha_ref[0])
    h = jnp.dot(h.astype(w2_ref.dtype), w2_ref[...],
                preferred_element_type=jnp.float32) + b2_ref[...]
    h = _prelu(h, alpha_ref[1])
    h = jnp.dot(h.astype(w3_ref.dtype), w3_ref[...],
                preferred_element_type=jnp.float32) + b3_ref[...]
    h = _prelu(h, alpha_ref[2])
    out_ref[...] = (h + sc).astype(out_ref.dtype)


def mlp_kernel_fused(x_ref, w1s_ref, b1s_ref, w2_ref, b2_ref, w3_ref, b3_ref,
                     alpha_ref, out_ref):
    # Used only when out_ft % 128 == 0 so the in-kernel split below is lane-aligned.
    n_out = out_ref.shape[-1]
    x = x_ref[...].astype(w1s_ref.dtype)          # f32 -> bf16 cast fused into kernel
    y = jnp.dot(x, w1s_ref[...], preferred_element_type=jnp.float32) + b1s_ref[...]
    _ffn_tail(y[:, :n_out], y[:, n_out:], w2_ref, b2_ref, w3_ref, b3_ref,
              alpha_ref, out_ref)


def mlp_kernel_split(x_ref, w1_ref, b1_ref, ws_ref, bs_ref, w2_ref, b2_ref,
                     w3_ref, b3_ref, alpha_ref, out_ref):
    x = x_ref[...].astype(w1_ref.dtype)
    h = jnp.dot(x, w1_ref[...], preferred_element_type=jnp.float32) + b1_ref[...]
    sc = jnp.dot(x, ws_ref[...], preferred_element_type=jnp.float32) + bs_ref[...]
    _ffn_tail(h, sc, w2_ref, b2_ref, w3_ref, b3_ref, alpha_ref, out_ref)


def _vmem_budget():
    """Generation-aware usable-VMEM budget (~96 MiB v5e/v6e, ~48 MiB v7x)."""
    try:
        cap = int(pltpu.get_tpu_info().vmem_capacity_bytes)
    except Exception:
        cap = 64 * 1024 * 1024
    return max(cap * 3 // 4, 32 * 1024 * 1024)


def _vmem_estimate(tile_n, in_ft, out_ft, w_bytes, out_bytes):
    # Pipeline allocates 2 buffers per input by default; count weights at 2x even
    # though we request Buffered(1) for them (that only buys extra headroom).
    weights = 2 * (2 * in_ft * out_ft + 2 * out_ft * out_ft) * w_bytes
    biases = 2 * 4 * out_ft * 4
    x_buf = 2 * tile_n * in_ft * 4                       # x stays f32 in HBM
    out_buf = 2 * tile_n * out_ft * out_bytes
    # f32 y (2*out wide) + f32 h chain + bf16 matmul copies + bf16 x copy + out staging
    temps = tile_n * (in_ft * w_bytes + out_ft * (8 + 8 + 4 + out_bytes))
    return weights + biases + x_buf + out_buf + temps


def _pick_tile_n(n_rows, in_ft, out_ft, w_bytes, out_bytes, budget):
    cap = _round_up(n_rows, 8)
    for cand in (4096, 2048, 1024, 512, 256, 128, 64, 32, 16, 8):
        if cand <= cap and _vmem_estimate(cand, in_ft, out_ft,
                                          w_bytes, out_bytes) <= budget:
            return cand
    return 8


def _mlp_fast(x, params, *, w_dtype, out_dtype, budget):
    n_rows, in_ft = x.shape
    out_ft = params["w1"].shape[1]
    w_bytes = jnp.dtype(w_dtype).itemsize
    out_bytes = jnp.dtype(out_dtype).itemsize

    tile_n = _pick_tile_n(n_rows, in_ft, out_ft, w_bytes, out_bytes, budget)
    n_pad = _round_up(n_rows, tile_n)
    x_in = x if n_pad == n_rows else jnp.pad(x, ((0, n_pad - n_rows), (0, 0)))
    grid = (n_pad // tile_n,)

    w2 = params["w2"].astype(w_dtype)
    b2 = params["b2"].astype(jnp.float32)
    w3 = params["w3"].astype(w_dtype)
    b3 = params["b3"].astype(jnp.float32)
    alphas = params["alphas"].astype(jnp.float32)

    fuse = (out_ft % 128 == 0)   # fused W1|Ws matmul only when the split is lane-aligned
    if fuse:
        kernel = mlp_kernel_fused
        weight_args = [
            jnp.concatenate([params["w1"], params["ws"]], axis=1).astype(w_dtype),
            jnp.concatenate([params["b1"], params["bs"]], axis=1).astype(jnp.float32),
            w2, b2, w3, b3,
        ]
    else:
        kernel = mlp_kernel_split
        weight_args = [
            params["w1"].astype(w_dtype), params["b1"].astype(jnp.float32),
            params["ws"].astype(w_dtype), params["bs"].astype(jnp.float32),
            w2, b2, w3, b3,
        ]

    flops = 2 * n_rows * (2 * in_ft * out_ft + 2 * out_ft * out_ft)
    bytes_accessed = (n_rows * in_ft * 4
                      + (2 * in_ft * out_ft + 2 * out_ft * out_ft) * w_bytes
                      + 4 * out_ft * 4
                      + n_rows * out_ft * out_bytes)
    cost = pl.CostEstimate(flops=flops, transcendentals=0,
                           bytes_accessed=bytes_accessed)

    def build_and_call(single_buffer_weights):
        def wspec(arr):
            if single_buffer_weights:
                return pl.BlockSpec(arr.shape, lambda i: (0, 0),
                                    pipeline_mode=pl.Buffered(1))
            return pl.BlockSpec(arr.shape, lambda i: (0, 0))

        in_specs = ([pl.BlockSpec((tile_n, in_ft), lambda i: (i, 0))]      # x row tiles
                    + [wspec(w) for w in weight_args]                       # resident
                    + [pl.BlockSpec(memory_space=pltpu.MemorySpace.SMEM)])  # PReLU alphas
        return pl.pallas_call(
            kernel,
            out_shape=jax.ShapeDtypeStruct((n_pad, out_ft), out_dtype),
            grid=grid,
            in_specs=in_specs,
            out_specs=pl.BlockSpec((tile_n, out_ft), lambda i: (i, 0)),
            compiler_params=pltpu.CompilerParams(
                dimension_semantics=("parallel",),
                vmem_limit_bytes=budget),
            cost_estimate=cost,
        )(x_in, *weight_args, alphas)

    try:
        # Weights never change across grid steps -> single buffer halves their VMEM.
        out_p = build_and_call(True)
    except Exception:
        # pipeline_mode / Buffered(1) not supported -> default double-buffered weights.
        out_p = build_and_call(False)

    return out_p if n_pad == n_rows else out_p[:n_rows]


# ---------------------------------------------------------------------------
# Fallback path: per-layer K/N-tiled matmul kernels (weights streamed, f32 accumulator).
# Used when resident weights would not comfortably fit in VMEM (large out_ft, v7x).
# ---------------------------------------------------------------------------
def _linear_kernel(x_ref, w_ref, b_ref, alpha_ref, o_ref, acc_ref):
    k = pl.program_id(2)

    @pl.when(k == 0)
    def _():
        acc_ref[...] = jnp.zeros_like(acc_ref)

    acc_ref[...] += jnp.dot(x_ref[...].astype(w_ref.dtype), w_ref[...],
                            preferred_element_type=jnp.float32)

    @pl.when(k == pl.num_programs(2) - 1)
    def _():
        h = acc_ref[...] + b_ref[...]
        o_ref[...] = jnp.where(h >= 0, h, alpha_ref[0] * h).astype(o_ref.dtype)


def _linear_residual_kernel(x_ref, w_ref, b_ref, alpha_ref, res_ref, o_ref, acc_ref):
    k = pl.program_id(2)

    @pl.when(k == 0)
    def _():
        acc_ref[...] = jnp.zeros_like(acc_ref)

    acc_ref[...] += jnp.dot(x_ref[...].astype(w_ref.dtype), w_ref[...],
                            preferred_element_type=jnp.float32)

    @pl.when(k == pl.num_programs(2) - 1)
    def _():
        h = acc_ref[...] + b_ref[...]
        h = jnp.where(h >= 0, h, alpha_ref[0] * h)
        o_ref[...] = (h + res_ref[...].astype(jnp.float32)).astype(o_ref.dtype)


def _tiled_linear(x, w, b, alpha, residual=None, *, w_dtype, out_dtype, vmem_limit,
                  tm_max=256, tn_max=512, tk_max=512):
    m, k_dim = x.shape
    _, n = w.shape
    tm = min(tm_max, _round_up(m, 8))
    tk = min(tk_max, _round_up(k_dim, 128))
    tn = min(tn_max, _round_up(n, 128))
    mp, kp, np_ = _round_up(m, tm), _round_up(k_dim, tk), _round_up(n, tn)

    xp = x if (mp, kp) == (m, k_dim) else jnp.pad(x, ((0, mp - m), (0, kp - k_dim)))
    wp = (w if (kp, np_) == (k_dim, n)
          else jnp.pad(w, ((0, kp - k_dim), (0, np_ - n)))).astype(w_dtype)
    bp = (b if np_ == n else jnp.pad(b, ((0, 0), (0, np_ - n)))).astype(jnp.float32)
    alpha = jnp.asarray(alpha, jnp.float32).reshape((1,))

    in_specs = [
        pl.BlockSpec((tm, tk), lambda i, j, kk: (i, kk)),
        pl.BlockSpec((tk, tn), lambda i, j, kk: (kk, j)),
        pl.BlockSpec((1, tn), lambda i, j, kk: (0, j)),
        pl.BlockSpec(memory_space=pltpu.MemorySpace.SMEM),
    ]
    args = [xp, wp, bp, alpha]
    if residual is None:
        kernel = _linear_kernel
    else:
        kernel = _linear_residual_kernel
        rp = (residual if (mp, np_) == residual.shape
              else jnp.pad(residual, ((0, mp - m), (0, np_ - n))))
        in_specs.append(pl.BlockSpec((tm, tn), lambda i, j, kk: (i, j)))
        args.append(rp)

    out = pl.pallas_call(
        kernel,
        out_shape=jax.ShapeDtypeStruct((mp, np_), out_dtype),
        grid=(mp // tm, np_ // tn, kp // tk),
        in_specs=in_specs,
        out_specs=pl.BlockSpec((tm, tn), lambda i, j, kk: (i, j)),
        scratch_shapes=[pltpu.VMEM((tm, tn), jnp.float32)],
        compiler_params=pltpu.CompilerParams(
            dimension_semantics=("parallel", "parallel", "arbitrary"),
            vmem_limit_bytes=vmem_limit),
    )(*args)
    return out if (mp, np_) == (m, n) else out[:m, :n]


def _mlp_fallback(x, params, *, w_dtype, out_dtype, vmem_limit):
    alphas = params["alphas"].astype(jnp.float32)
    one = jnp.ones((1,), jnp.float32)            # PReLU with alpha == 1 is identity
    sc = _tiled_linear(x, params["ws"], params["bs"], one,
                       w_dtype=w_dtype, out_dtype=jnp.float32, vmem_limit=vmem_limit)
    h = _tiled_linear(x, params["w1"], params["b1"], alphas[0:1],
                      w_dtype=w_dtype, out_dtype=w_dtype, vmem_limit=vmem_limit)
    h = _tiled_linear(h, params["w2"], params["b2"], alphas[1:2],
                      w_dtype=w_dtype, out_dtype=w_dtype, vmem_limit=vmem_limit)
    return _tiled_linear(h, params["w3"], params["b3"], alphas[2:3], residual=sc,
                         w_dtype=w_dtype, out_dtype=out_dtype, vmem_limit=vmem_limit)


# ---------------------------------------------------------------------------
# Public entry point
# ---------------------------------------------------------------------------
def mlp_forward(x, params, *, use_bf16=True, out_dtype=jnp.bfloat16,
                force_fallback=False):
    """x: (N, in_ft) f32.  params: weights stored transposed as (in, out)."""
    _, in_ft = x.shape
    out_ft = params["w1"].shape[1]
    w_dtype = jnp.bfloat16 if use_bf16 else jnp.float32
    w_bytes = jnp.dtype(w_dtype).itemsize
    out_bytes = jnp.dtype(out_dtype).itemsize
    budget = _vmem_budget()

    # Resident-weight footprint, conservatively assuming the default 2 pipeline buffers.
    resident_w = 2 * (2 * in_ft * out_ft + 2 * out_ft * out_ft) * w_bytes
    if force_fallback or resident_w > budget // 3:
        return _mlp_fallback(x, params, w_dtype=w_dtype, out_dtype=out_dtype,
                             vmem_limit=budget)
    return _mlp_fast(x, params, w_dtype=w_dtype, out_dtype=out_dtype, budget=budget)


# ---------------------------------------------------------------------------
# Init / reference / test
# ---------------------------------------------------------------------------
def init_params(key, in_ft, out_ft):
    """Deterministic init mimicking PyTorch Linear's uniform(+/-1/sqrt(fan_in)) init."""
    ks = jax.random.split(key, 8)

    def linear(kw, kb, fan_in, fan_out):
        bound = 1.0 / (fan_in ** 0.5)
        # stored transposed: (fan_in, fan_out) so the kernel does x @ W
        w = jax.random.uniform(kw, (fan_in, fan_out), jnp.float32, -bound, bound)
        b = jax.random.uniform(kb, (1, fan_out), jnp.float32, -bound, bound)
        return w, b

    w1, b1 = linear(ks[0], ks[1], in_ft, out_ft)
    w2, b2 = linear(ks[2], ks[3], out_ft, out_ft)
    w3, b3 = linear(ks[4], ks[5], out_ft, out_ft)
    ws, bs = linear(ks[6], ks[7], in_ft, out_ft)
    return {
        "w1": w1, "b1": b1,
        "w2": w2, "b2": b2,
        "w3": w3, "b3": b3,
        "ws": ws, "bs": bs,
        "alphas": jnp.full((3,), 0.25, jnp.float32),   # three nn.PReLU() scalars
    }


def mlp_reference(x, p, *, use_bf16=True):
    """Pure-JAX reference with the same (bf16-in / f32-accumulate) matmul precision."""
    w_dtype = jnp.bfloat16 if use_bf16 else jnp.float32

    def mm(a, b):
        return jnp.dot(a.astype(w_dtype), b.astype(w_dtype),
                       preferred_element_type=jnp.float32)

    a = p["alphas"]
    h = _prelu(mm(x, p["w1"]) + p["b1"], a[0])
    h = _prelu(mm(h, p["w2"]) + p["b2"], a[1])
    h = _prelu(mm(h, p["w3"]) + p["b3"], a[2])
    return h + mm(x, p["ws"]) + p["bs"]


def _check(out, ref, tag):
    err = float(jnp.max(jnp.abs(out.astype(jnp.float32) - ref)))
    assert jnp.allclose(out.astype(jnp.float32), ref, atol=2e-2, rtol=2e-2), (tag, err)


if __name__ == "__main__":
    key = jax.random.PRNGKey(0)
    k_x, k_p, k_x2, k_p2 = jax.random.split(key, 4)

    # 1) Small shape from the module spec -> fast path, split (unaligned out_ft=32).
    N, in_ft, out_ft = 8, 32, 32
    x = jax.random.normal(k_x, (N, in_ft), jnp.float32)
    params = init_params(k_p, in_ft, out_ft)
    out = mlp_forward(x, params)
    jax.block_until_ready(out)
    assert out.shape == (N, out_ft)
    _check(out, mlp_reference(x, params), "fast-split")

    # 2) Lane-aligned out_ft -> exercises the fused W1|Ws kernel.
    N2, in2, out2 = 16, 64, 128
    x2 = jax.random.normal(k_x2, (N2, in2), jnp.float32)
    params2 = init_params(k_p2, in2, out2)
    out_f = mlp_forward(x2, params2)
    jax.block_until_ready(out_f)
    assert out_f.shape == (N2, out2)
    _check(out_f, mlp_reference(x2, params2), "fast-fused")

    # 3) Exercise the feature/K-tiled fallback (used when weights exceed VMEM budget).
    out_fb = mlp_forward(x, params, force_fallback=True)
    jax.block_until_ready(out_fb)
    assert out_fb.shape == (N, out_ft)
    _check(out_fb, mlp_reference(x, params), "fallback")

    print("KERNEL_OK")
</pallas_src>

<mosaic_0001>
module attributes {stable_mosaic.version = 11 : i64} {
  func.func @mlp_kernel_split(%arg0: i32, %arg1: memref<8x32xf32, #tpu.memory_space<vmem>>, %arg2: memref<32x32xbf16, #tpu.memory_space<vmem>>, %arg3: memref<1x32xf32, #tpu.memory_space<vmem>>, %arg4: memref<32x32xbf16, #tpu.memory_space<vmem>>, %arg5: memref<1x32xf32, #tpu.memory_space<vmem>>, %arg6: memref<32x32xbf16, #tpu.memory_space<vmem>>, %arg7: memref<1x32xf32, #tpu.memory_space<vmem>>, %arg8: memref<32x32xbf16, #tpu.memory_space<vmem>>, %arg9: memref<1x32xf32, #tpu.memory_space<vmem>>, %arg10: memref<3xf32, #tpu.memory_space<smem>>, %arg11: memref<8x32xbf16, #tpu.memory_space<vmem>>) attributes {dimension_semantics = [#tpu.dimension_semantics<parallel>], iteration_bounds = array<i64: 1>, scalar_prefetch = 0 : i64, scratch_operands = 0 : i64, tpu.core_type = #tpu.core_type<tc>, window_params = [{transform_indices = @transform_0, window_bounds = array<i64: 8, 32>}, {pipeline_mode = #tpu.pipeline_mode<synchronous>, transform_indices = @transform_1, window_bounds = array<i64: 32, 32>}, {pipeline_mode = #tpu.pipeline_mode<synchronous>, transform_indices = @transform_2, window_bounds = array<i64: 1, 32>}, {pipeline_mode = #tpu.pipeline_mode<synchronous>, transform_indices = @transform_3, window_bounds = array<i64: 32, 32>}, {pipeline_mode = #tpu.pipeline_mode<synchronous>, transform_indices = @transform_4, window_bounds = array<i64: 1, 32>}, {pipeline_mode = #tpu.pipeline_mode<synchronous>, transform_indices = @transform_5, window_bounds = array<i64: 32, 32>}, {pipeline_mode = #tpu.pipeline_mode<synchronous>, transform_indices = @transform_6, window_bounds = array<i64: 1, 32>}, {pipeline_mode = #tpu.pipeline_mode<synchronous>, transform_indices = @transform_7, window_bounds = array<i64: 32, 32>}, {pipeline_mode = #tpu.pipeline_mode<synchronous>, transform_indices = @transform_8, window_bounds = array<i64: 1, 32>}, {transform_indices = @transform_9, window_bounds = array<i64: 3>}, {transform_indices = @transform_10, window_bounds = array<i64: 8, 32>}]} {
    %c0 = arith.constant 0 : index
    %c0_0 = arith.constant 0 : index
    %0 = vector.load %arg1[%c0, %c0_0] : memref<8x32xf32, #tpu.memory_space<vmem>>, vector<8x32xf32>
    %1 = arith.truncf %0 : vector<8x32xf32> to vector<8x32xbf16>
    %c0_1 = arith.constant 0 : index
    %c0_2 = arith.constant 0 : index
    %2 = vector.load %arg2[%c0_1, %c0_2] : memref<32x32xbf16, #tpu.memory_space<vmem>>, vector<32x32xbf16>
    %cst = arith.constant dense<0.000000e+00> : vector<8x32xf32>
    %3 = tpu.matmul %1, %2, %cst {dimension_numbers = #tpu.dot_dimension_numbers<[1], [0], [0], [1], [0, 0, 1, 1], [], []>} : vector<8x32xbf16>, vector<32x32xbf16>, vector<8x32xf32> -> vector<8x32xf32>
    %c0_3 = arith.constant 0 : index
    %c0_4 = arith.constant 0 : index
    %4 = vector.load %arg3[%c0_3, %c0_4] : memref<1x32xf32, #tpu.memory_space<vmem>>, vector<1x32xf32>
    %5 = vector.broadcast %4 : vector<1x32xf32> to vector<8x32xf32>
    %6 = arith.addf %3, %5 : vector<8x32xf32>
    %c0_5 = arith.constant 0 : index
    %c0_6 = arith.constant 0 : index
    %7 = vector.load %arg4[%c0_5, %c0_6] : memref<32x32xbf16, #tpu.memory_space<vmem>>, vector<32x32xbf16>
    %cst_7 = arith.constant dense<0.000000e+00> : vector<8x32xf32>
    %8 = tpu.matmul %1, %7, %cst_7 {dimension_numbers = #tpu.dot_dimension_numbers<[1], [0], [0], [1], [0, 0, 1, 1], [], []>} : vector<8x32xbf16>, vector<32x32xbf16>, vector<8x32xf32> -> vector<8x32xf32>
    %c0_8 = arith.constant 0 : index
    %c0_9 = arith.constant 0 : index
    %9 = vector.load %arg5[%c0_8, %c0_9] : memref<1x32xf32, #tpu.memory_space<vmem>>, vector<1x32xf32>
    %10 = vector.broadcast %9 : vector<1x32xf32> to vector<8x32xf32>
    %11 = arith.addf %8, %10 : vector<8x32xf32>
    %c0_10 = arith.constant 0 : index
    %12 = memref.load %arg10[%c0_10] : memref<3xf32, #tpu.memory_space<smem>>
    %cst_11 = arith.constant 0.000000e+00 : f32
    %13 = vector.broadcast %cst_11 : f32 to vector<8x32xf32>
    %14 = arith.cmpf oge, %6, %13 : vector<8x32xf32>
    %15 = vector.broadcast %12 : f32 to vector<8x32xf32>
    %16 = arith.mulf %15, %6 : vector<8x32xf32>
    %17 = arith.select %14, %6, %16 : vector<8x32xi1>, vector<8x32xf32>
    %18 = arith.truncf %17 : vector<8x32xf32> to vector<8x32xbf16>
    %c0_12 = arith.constant 0 : index
    %c0_13 = arith.constant 0 : index
    %19 = vector.load %arg6[%c0_12, %c0_13] : memref<32x32xbf16, #tpu.memory_space<vmem>>, vector<32x32xbf16>
    %cst_14 = arith.constant dense<0.000000e+00> : vector<8x32xf32>
    %20 = tpu.matmul %18, %19, %cst_14 {dimension_numbers = #tpu.dot_dimension_numbers<[1], [0], [0], [1], [0, 0, 1, 1], [], []>} : vector<8x32xbf16>, vector<32x32xbf16>, vector<8x32xf32> -> vector<8x32xf32>
    %c0_15 = arith.constant 0 : index
    %c0_16 = arith.constant 0 : index
    %21 = vector.load %arg7[%c0_15, %c0_16] : memref<1x32xf32, #tpu.memory_space<vmem>>, vector<1x32xf32>
    %22 = vector.broadcast %21 : vector<1x32xf32> to vector<8x32xf32>
    %23 = arith.addf %20, %22 : vector<8x32xf32>
    %c1 = arith.constant 1 : index
    %24 = memref.load %arg10[%c1] : memref<3xf32, #tpu.memory_space<smem>>
    %cst_17 = arith.constant 0.000000e+00 : f32
    %25 = vector.broadcast %cst_17 : f32 to vector<8x32xf32>
    %26 = arith.cmpf oge, %23, %25 : vector<8x32xf32>
    %27 = vector.broadcast %24 : f32 to vector<8x32xf32>
    %28 = arith.mulf %27, %23 : vector<8x32xf32>
    %29 = arith.select %26, %23, %28 : vector<8x32xi1>, vector<8x32xf32>
    %30 = arith.truncf %29 : vector<8x32xf32> to vector<8x32xbf16>
    %c0_18 = arith.constant 0 : index
    %c0_19 = arith.constant 0 : index
    %31 = vector.load %arg8[%c0_18, %c0_19] : memref<32x32xbf16, #tpu.memory_space<vmem>>, vector<32x32xbf16>
    %cst_20 = arith.constant dense<0.000000e+00> : vector<8x32xf32>
    %32 = tpu.matmul %30, %31, %cst_20 {dimension_numbers = #tpu.dot_dimension_numbers<[1], [0], [0], [1], [0, 0, 1, 1], [], []>} : vector<8x32xbf16>, vector<32x32xbf16>, vector<8x32xf32> -> vector<8x32xf32>
    %c0_21 = arith.constant 0 : index
    %c0_22 = arith.constant 0 : index
    %33 = vector.load %arg9[%c0_21, %c0_22] : memref<1x32xf32, #tpu.memory_space<vmem>>, vector<1x32xf32>
    %34 = vector.broadcast %33 : vector<1x32xf32> to vector<8x32xf32>
    %35 = arith.addf %32, %34 : vector<8x32xf32>
    %c2 = arith.constant 2 : index
    %36 = memref.load %arg10[%c2] : memref<3xf32, #tpu.memory_space<smem>>
    %cst_23 = arith.constant 0.000000e+00 : f32
    %37 = vector.broadcast %cst_23 : f32 to vector<8x32xf32>
    %38 = arith.cmpf oge, %35, %37 : vector<8x32xf32>
    %39 = vector.broadcast %36 : f32 to vector<8x32xf32>
    %40 = arith.mulf %39, %35 : vector<8x32xf32>
    %41 = arith.select %38, %35, %40 : vector<8x32xi1>, vector<8x32xf32>
    %42 = arith.addf %41, %11 : vector<8x32xf32>
    %43 = arith.truncf %42 : vector<8x32xf32> to vector<8x32xbf16>
    %c0_24 = arith.constant 0 : index
    %c0_25 = arith.constant 0 : index
    %44 = vector.load %arg11[%c0_24, %c0_25] : memref<8x32xbf16, #tpu.memory_space<vmem>>, vector<8x32xbf16>
    tpu.vector_store %arg11[%c0_24, %c0_25], %43 {strides = array<i32>} : memref<8x32xbf16, #tpu.memory_space<vmem>>, vector<8x32xbf16>,
    return
  }
  func.func @transform_0(%arg0: i32) -> (i32, i32) {
    %c0_i32 = arith.constant 0 : i32
    %c0_i32_0 = arith.constant 0 : i32
    return %arg0, %c0_i32 : i32, i32
  }
  func.func @transform_1(%arg0: i32) -> (i32, i32) {
    %c0_i32 = arith.constant 0 : i32
    %c0_i32_0 = arith.constant 0 : i32
    %c0_i32_1 = arith.constant 0 : i32
    return %c0_i32, %c0_i32_0 : i32, i32
  }
  func.func @transform_2(%arg0: i32) -> (i32, i32) {
    %c0_i32 = arith.constant 0 : i32
    %c0_i32_0 = arith.constant 0 : i32
    %c0_i32_1 = arith.constant 0 : i32
    return %c0_i32, %c0_i32_0 : i32, i32
  }
  func.func @transform_3(%arg0: i32) -> (i32, i32) {
    %c0_i32 = arith.constant 0 : i32
    %c0_i32_0 = arith.constant 0 : i32
    %c0_i32_1 = arith.constant 0 : i32
    return %c0_i32, %c0_i32_0 : i32, i32
  }
  func.func @transform_4(%arg0: i32) -> (i32, i32) {
    %c0_i32 = arith.constant 0 : i32
    %c0_i32_0 = arith.constant 0 : i32
    %c0_i32_1 = arith.constant 0 : i32
    return %c0_i32, %c0_i32_0 : i32, i32
  }
  func.func @transform_5(%arg0: i32) -> (i32, i32) {
    %c0_i32 = arith.constant 0 : i32
    %c0_i32_0 = arith.constant 0 : i32
    %c0_i32_1 = arith.constant 0 : i32
    return %c0_i32, %c0_i32_0 : i32, i32
  }
  func.func @transform_6(%arg0: i32) -> (i32, i32) {
    %c0_i32 = arith.constant 0 : i32
    %c0_i32_0 = arith.constant 0 : i32
    %c0_i32_1 = arith.constant 0 : i32
    return %c0_i32, %c0_i32_0 : i32, i32
  }
  func.func @transform_7(%arg0: i32) -> (i32, i32) {
    %c0_i32 = arith.constant 0 : i32
    %c0_i32_0 = arith.constant 0 : i32
    %c0_i32_1 = arith.constant 0 : i32
    return %c0_i32, %c0_i32_0 : i32, i32
  }
  func.func @transform_8(%arg0: i32) -> (i32, i32) {
    %c0_i32 = arith.constant 0 : i32
    %c0_i32_0 = arith.constant 0 : i32
    %c0_i32_1 = arith.constant 0 : i32
    return %c0_i32, %c0_i32_0 : i32, i32
  }
  func.func @transform_9(%arg0: i32) -> i32 {
    %c0_i32 = arith.constant 0 : i32
    %c0_i32_0 = arith.constant 0 : i32
    return %c0_i32 : i32
  }
  func.func @transform_10(%arg0: i32) -> (i32, i32) {
    %c0_i32 = arith.constant 0 : i32
    %c0_i32_0 = arith.constant 0 : i32
    return %arg0, %c0_i32 : i32, i32
  }
}

module attributes {stable_mosaic.version = 11 : i64} {
  func.func @mlp_kernel_split(%arg0: i32, %arg1: memref<8x32xf32, #tpu.memory_space<vmem>>, %arg2: memref<32x32xbf16, #tpu.memory_space<vmem>>, %arg3: memref<1x32xf32, #tpu.memory_space<vmem>>, %arg4: memref<32x32xbf16, #tpu.memory_space<vmem>>, %arg5: memref<1x32xf32, #tpu.memory_space<vmem>>, %arg6: memref<32x32xbf16, #tpu.memory_space<vmem>>, %arg7: memref<1x32xf32, #tpu.memory_space<vmem>>, %arg8: memref<32x32xbf16, #tpu.memory_space<vmem>>, %arg9: memref<1x32xf32, #tpu.memory_space<vmem>>, %arg10: memref<3xf32, #tpu.memory_space<smem>>, %arg11: memref<8x32xbf16, #tpu.memory_space<vmem>>) attributes {dimension_semantics = [#tpu.dimension_semantics<parallel>], iteration_bounds = array<i64: 1>, scalar_prefetch = 0 : i64, scratch_operands = 0 : i64, tpu.core_type = #tpu.core_type<tc>, window_params = [{transform_indices = @transform_0, window_bounds = array<i64: 8, 32>}, {pipeline_mode = #tpu.pipeline_mode<synchronous>, transform_indices = @transform_1, window_bounds = array<i64: 32, 32>}, {pipeline_mode = #tpu.pipeline_mode<synchronous>, transform_indices = @transform_2, window_bounds = array<i64: 1, 32>}, {pipeline_mode = #tpu.pipeline_mode<synchronous>, transform_indices = @transform_3, window_bounds = array<i64: 32, 32>}, {pipeline_mode = #tpu.pipeline_mode<synchronous>, transform_indices = @transform_4, window_bounds = array<i64: 1, 32>}, {pipeline_mode = #tpu.pipeline_mode<synchronous>, transform_indices = @transform_5, window_bounds = array<i64: 32, 32>}, {pipeline_mode = #tpu.pipeline_mode<synchronous>, transform_indices = @transform_6, window_bounds = array<i64: 1, 32>}, {pipeline_mode = #tpu.pipeline_mode<synchronous>, transform_indices = @transform_7, window_bounds = array<i64: 32, 32>}, {pipeline_mode = #tpu.pipeline_mode<synchronous>, transform_indices = @transform_8, window_bounds = array<i64: 1, 32>}, {transform_indices = @transform_9, window_bounds = array<i64: 3>}, {transform_indices = @transform_10, window_bounds = array<i64: 8, 32>}]} {
    %c0 = arith.constant 0 : index
    %c0_0 = arith.constant 0 : index
    %0 = vector.load %arg1[%c0, %c0_0] : memref<8x32xf32, #tpu.memory_space<vmem>>, vector<8x32xf32>
    %1 = arith.truncf %0 : vector<8x32xf32> to vector<8x32xbf16>
    %c0_1 = arith.constant 0 : index
    %c0_2 = arith.constant 0 : index
    %2 = vector.load %arg2[%c0_1, %c0_2] : memref<32x32xbf16, #tpu.memory_space<vmem>>, vector<32x32xbf16>
    %cst = arith.constant dense<0.000000e+00> : vector<8x32xf32>
    %3 = tpu.matmul %1, %2, %cst {dimension_numbers = #tpu.dot_dimension_numbers<[1], [0], [0], [1], [0, 0, 1, 1], [], []>} : vector<8x32xbf16>, vector<32x32xbf16>, vector<8x32xf32> -> vector<8x32xf32>
    %c0_3 = arith.constant 0 : index
    %c0_4 = arith.constant 0 : index
    %4 = vector.load %arg3[%c0_3, %c0_4] : memref<1x32xf32, #tpu.memory_space<vmem>>, vector<1x32xf32>
    %5 = vector.broadcast %4 : vector<1x32xf32> to vector<8x32xf32>
    %6 = arith.addf %3, %5 : vector<8x32xf32>
    %c0_5 = arith.constant 0 : index
    %c0_6 = arith.constant 0 : index
    %7 = vector.load %arg4[%c0_5, %c0_6] : memref<32x32xbf16, #tpu.memory_space<vmem>>, vector<32x32xbf16>
    %cst_7 = arith.constant dense<0.000000e+00> : vector<8x32xf32>
    %8 = tpu.matmul %1, %7, %cst_7 {dimension_numbers = #tpu.dot_dimension_numbers<[1], [0], [0], [1], [0, 0, 1, 1], [], []>} : vector<8x32xbf16>, vector<32x32xbf16>, vector<8x32xf32> -> vector<8x32xf32>
    %c0_8 = arith.constant 0 : index
    %c0_9 = arith.constant 0 : index
    %9 = vector.load %arg5[%c0_8, %c0_9] : memref<1x32xf32, #tpu.memory_space<vmem>>, vector<1x32xf32>
    %10 = vector.broadcast %9 : vector<1x32xf32> to vector<8x32xf32>
    %11 = arith.addf %8, %10 : vector<8x32xf32>
    %c0_10 = arith.constant 0 : index
    %12 = memref.load %arg10[%c0_10] : memref<3xf32, #tpu.memory_space<smem>>
    %cst_11 = arith.constant 0.000000e+00 : f32
    %13 = vector.broadcast %cst_11 : f32 to vector<8x32xf32>
    %14 = arith.cmpf oge, %6, %13 : vector<8x32xf32>
    %15 = vector.broadcast %12 : f32 to vector<8x32xf32>
    %16 = arith.mulf %15, %6 : vector<8x32xf32>
    %17 = arith.select %14, %6, %16 : vector<8x32xi1>, vector<8x32xf32>
    %18 = arith.truncf %17 : vector<8x32xf32> to vector<8x32xbf16>
    %c0_12 = arith.constant 0 : index
    %c0_13 = arith.constant 0 : index
    %19 = vector.load %arg6[%c0_12, %c0_13] : memref<32x32xbf16, #tpu.memory_space<vmem>>, vector<32x32xbf16>
    %cst_14 = arith.constant dense<0.000000e+00> : vector<8x32xf32>
    %20 = tpu.matmul %18, %19, %cst_14 {dimension_numbers = #tpu.dot_dimension_numbers<[1], [0], [0], [1], [0, 0, 1, 1], [], []>} : vector<8x32xbf16>, vector<32x32xbf16>, vector<8x32xf32> -> vector<8x32xf32>
    %c0_15 = arith.constant 0 : index
    %c0_16 = arith.constant 0 : index
    %21 = vector.load %arg7[%c0_15, %c0_16] : memref<1x32xf32, #tpu.memory_space<vmem>>, vector<1x32xf32>
    %22 = vector.broadcast %21 : vector<1x32xf32> to vector<8x32xf32>
    %23 = arith.addf %20, %22 : vector<8x32xf32>
    %c1 = arith.constant 1 : index
    %24 = memref.load %arg10[%c1] : memref<3xf32, #tpu.memory_space<smem>>
    %cst_17 = arith.constant 0.000000e+00 : f32
    %25 = vector.broadcast %cst_17 : f32 to vector<8x32xf32>
    %26 = arith.cmpf oge, %23, %25 : vector<8x32xf32>
    %27 = vector.broadcast %24 : f32 to vector<8x32xf32>
    %28 = arith.mulf %27, %23 : vector<8x32xf32>
    %29 = arith.select %26, %23, %28 : vector<8x32xi1>, vector<8x32xf32>
    %30 = arith.truncf %29 : vector<8x32xf32> to vector<8x32xbf16>
    %c0_18 = arith.constant 0 : index
    %c0_19 = arith.constant 0 : index
    %31 = vector.load %arg8[%c0_18, %c0_19] : memref<32x32xbf16, #tpu.memory_space<vmem>>, vector<32x32xbf16>
    %cst_20 = arith.constant dense<0.000000e+00> : vector<8x32xf32>
    %32 = tpu.matmul %30, %31, %cst_20 {dimension_numbers = #tpu.dot_dimension_numbers<[1], [0], [0], [1], [0, 0, 1, 1], [], []>} : vector<8x32xbf16>, vector<32x32xbf16>, vector<8x32xf32> -> vector<8x32xf32>
    %c0_21 = arith.constant 0 : index
    %c0_22 = arith.constant 0 : index
    %33 = vector.load %arg9[%c0_21, %c0_22] : memref<1x32xf32, #tpu.memory_space<vmem>>, vector<1x32xf32>
    %34 = vector.broadcast %33 : vector<1x32xf32> to vector<8x32xf32>
    %35 = arith.addf %32, %34 : vector<8x32xf32>
    %c2 = arith.constant 2 : index
    %36 = memref.load %arg10[%c2] : memref<3xf32, #tpu.memory_space<smem>>
    %cst_23 = arith.constant 0.000000e+00 : f32
    %37 = vector.broadcast %cst_23 : f32 to vector<8x32xf32>
    %38 = arith.cmpf oge, %35, %37 : vector<8x32xf32>
    %39 = vector.broadcast %36 : f32 to vector<8x32xf32>
    %40 = arith.mulf %39, %35 : vector<8x32xf32>
    %41 = arith.select %38, %35, %40 : vector<8x32xi1>, vector<8x32xf32>
    %42 = arith.addf %41, %11 : vector<8x32xf32>
    %43 = arith.truncf %42 : vector<8x32xf32> to vector<8x32xbf16>
    %c0_24 = arith.constant 0 : index
    %c0_25 = arith.constant 0 : index
    %44 = vector.load %arg11[%c0_24, %c0_25] : memref<8x32xbf16, #tpu.memory_space<vmem>>, vector<8x32xbf16>
    tpu.vector_store %arg11[%c0_24, %c0_25], %43 {strides = array<i32>} : memref<8x32xbf16, #tpu.memory_space<vmem>>, vector<8x32xbf16>,
    return
  }
  func.func @transform_0(%arg0: i32) -> (i32, i32) {
    %c0_i32 = arith.constant 0 : i32
    %c0_i32_0 = arith.constant 0 : i32
    return %arg0, %c0_i32 : i32, i32
  }
  func.func @transform_1(%arg0: i32) -> (i32, i32) {
    %c0_i32 = arith.constant 0 : i32
    %c0_i32_0 = arith.constant 0 : i32
    %c0_i32_1 = arith.constant 0 : i32
    return %c0_i32, %c0_i32_0 : i32, i32
  }
  func.func @transform_2(%arg0: i32) -> (i32, i32) {
    %c0_i32 = arith.constant 0 : i32
    %c0_i32_0 = arith.constant 0 : i32
    %c0_i32_1 = arith.constant 0 : i32
    return %c0_i32, %c0_i32_0 : i32, i32
  }
  func.func @transform_3(%arg0: i32) -> (i32, i32) {
    %c0_i32 = arith.constant 0 : i32
    %c0_i32_0 = arith.constant 0 : i32
    %c0_i32_1 = arith.constant 0 : i32
    return %c0_i32, %c0_i32_0 : i32, i32
  }
  func.func @transform_4(%arg0: i32) -> (i32, i32) {
    %c0_i32 = arith.constant 0 : i32
    %c0_i32_0 = arith.constant 0 : i32
    %c0_i32_1 = arith.constant 0 : i32
    return %c0_i32, %c0_i32_0 : i32, i32
  }
  func.func @transform_5(%arg0: i32) -> (i32, i32) {
    %c0_i32 = arith.constant 0 : i32
    %c0_i32_0 = arith.constant 0 : i32
    %c0_i32_1 = arith.constant 0 : i32
    return %c0_i32, %c0_i32_0 : i32, i32
  }
  func.func @transform_6(%arg0: i32) -> (i32, i32) {
    %c0_i32 = arith.constant 0 : i32
    %c0_i32_0 = arith.constant 0 : i32
    %c0_i32_1 = arith.constant 0 : i32
    return %c0_i32, %c0_i32_0 : i32, i32
  }
  func.func @transform_7(%arg0: i32) -> (i32, i32) {
    %c0_i32 = arith.constant 0 : i32
    %c0_i32_0 = arith.constant 0 : i32
    %c0_i32_1 = arith.constant 0 : i32
    return %c0_i32, %c0_i32_0 : i32, i32
  }
  func.func @transform_8(%arg0: i32) -> (i32, i32) {
    %c0_i32 = arith.constant 0 : i32
    %c0_i32_0 = arith.constant 0 : i32
    %c0_i32_1 = arith.constant 0 : i32
    return %c0_i32, %c0_i32_0 : i32, i32
  }
  func.func @transform_9(%arg0: i32) -> i32 {
    %c0_i32 = arith.constant 0 : i32
    %c0_i32_0 = arith.constant 0 : i32
    return %c0_i32 : i32
  }
  func.func @transform_10(%arg0: i32) -> (i32, i32) {
    %c0_i32 = arith.constant 0 : i32
    %c0_i32_0 = arith.constant 0 : i32
    return %arg0, %c0_i32 : i32, i32
  }
}

</mosaic_0001>

<bundles_post_ra>
// kernel: tpu_custom_call.1
= control target key start
LH: loop header
LB: loop body
LE: loop exit
PB: predicated region body
PF: predicated region fallthrough
CT: control target
= control target key end

     0   :  { %15 = vsyncpa [#allocation3], 0  ;;  %s761_s0 = inlined_call_operand.hbm [shape: f32[8,32], index: 0, kind: input, shape index: {}]   ;;  %s762_s1 = inlined_call_operand.hbm [shape: bf16[32,32], index: 1, kind: input, shape index: {}]   ;;  %s763_s2 = inlined_call_operand.vmem [shape: f32[1,32], index: 2, kind: input, shape index: {}]   ;;  %s764_s3 = inlined_call_operand.hbm [shape: bf16[32,32], index: 3, kind: input, shape index: {}]   ;;  %s765_s4 = inlined_call_operand.vmem [shape: f32[1,32], index: 4, kind: input, shape index: {}]   ;;  %s766_s5 = inlined_call_operand.hbm [shape: bf16[32,32], index: 5, kind: input, shape index: {}]   ;;  %s767_s6 = inlined_call_operand.vmem [shape: f32[1,32], index: 6, kind: input, shape index: {}]   ;;  %s768_s7 = inlined_call_operand.hbm [shape: bf16[32,32], index: 7, kind: input, shape index: {}]   ;;  %s769_s8 = inlined_call_operand.vmem [shape: f32[1,32], index: 8, kind: input, shape index: {}]   ;;  %s770_s9 = inlined_call_operand.vmem [shape: f32[3], index: 9, kind: input, shape index: {}]   ;;  %s771_s10 = inlined_call_operand.hbm [shape: bf16[8,32], index: 10, kind: output, shape index: {}]  }
   0x1   :  { %16 = vsyncpa [#allocation7], 0 }
   0x2   :  { %17 = vsyncpa [#allocation10], 0 }
   0x3   :  { %18 = vsyncpa [#allocation5], 0 }
   0x4   :  { %19 = vsyncpa [#allocation4], 0  ;;  %s642_s13 = smov [#allocation6]  }
   0x5   :  { %s35_s14 = sshll.u32 %s642_s13, 4  ;;  %s36_s14 = int_to_ptr.vmem [resolvable:$true] %s35_s14 }
   0x6   :  { %s508_s15 = scalar_lea.vmem %s36_s14, 256  ;;  %p513_p1 = scmp.lt.s32.totalorder %s36_s14, %s36_s14 }
   0x7   :  { %p509_p0 = scmp.ne.s32.totalorder %s36_s14, %s508_s15  ;;  %p514_p2 = scmp.lt.s32.totalorder %s508_s15, %s508_s15 }
   0x9   :  { %p515_p3 = por %p514_p2, %p513_p1 }
   0xb   :  { %p516_p4 = pnand %p515_p3, %p509_p0 }
   0xd   :  { %519 = shalt.err (!%p516_p4)
}
   0xe   :  { %s643_s16 = smov 64   ;;  %s644_s17 = smov 4  }
   0xf   :  { %41 = dma.hbm_to_vmem [thread:$0]  %s762_s1, 256, %s36_s14, [#allocation7], %s643_s16, %s643_s16, %s644_s17  }
  0x10   :  { %s645_s20 = smov [#allocation9]   ;;  %s646_s22 = smov [#allocation2]  }
  0x11   :  { %s63_s21 = sshll.u32 %s645_s20, 4  ;;  %s26_s23 = sshll.u32 %s646_s22, 4  ;;  %s64_s21 = int_to_ptr.vmem [resolvable:$true] %s63_s21  ;;  %s27_s23 = int_to_ptr.vmem [resolvable:$true] %s26_s23 }
  0x12   :  { %s528_s24 = scalar_lea.vmem %s64_s21, 256  ;;  %p533_p6 = scmp.lt.s32.totalorder %s64_s21, %s64_s21 }
  0x13   :  { %p529_p5 = scmp.ne.s32.totalorder %s64_s21, %s528_s24  ;;  %p534_p7 = scmp.lt.s32.totalorder %s528_s24, %s528_s24 }
  0x15   :  { %p535_p8 = por %p534_p7, %p533_p6 }
  0x17   :  { %p536_p9 = pnand %p535_p8, %p529_p5 }
  0x19   :  { %539 = shalt.err (!%p536_p9)
}
  0x1a   :  { %69 = dma.hbm_to_vmem [thread:$0]  %s766_s5, 256, %s64_s21, [#allocation10], %s643_s16, %s643_s16, %s644_s17  }
  0x1b   :  { %s548_s1 = scalar_lea.vmem %s27_s23, 128  ;;  %p553_p11 = scmp.lt.s32.totalorder %s27_s23, %s27_s23 }
  0x1c   :  { %p549_p10 = scmp.ne.s32.totalorder %s27_s23, %s548_s1  ;;  %p554_p12 = scmp.lt.s32.totalorder %s548_s1, %s548_s1 }
  0x1e   :  { %p555_p13 = por %p554_p12, %p553_p11 }
  0x20   :  { %p556_p0 = pnand %p555_p13, %p549_p10 }
  0x22   :  { %559 = shalt.err (!%p556_p0)
}
  0x23   :  { %29 = dma.hbm_to_vmem [thread:$0]  %s761_s0, 128, %s27_s23, [#allocation3]  }
  0x24   :  { %s647_s29 = smov [#allocation8]   ;;  %s648_s11 = smov [#allocation11]  }
  0x25   :  { %s49_s30 = sshll.u32 %s647_s29, 4  ;;  %s77_s12 = sshll.u32 %s648_s11, 4  ;;  %s50_s30 = int_to_ptr.vmem [resolvable:$true] %s49_s30  ;;  %s78_s12 = int_to_ptr.vmem [resolvable:$true] %s77_s12 }
  0x26   :  { %s568_s13 = scalar_lea.vmem %s50_s30, 256  ;;  %p573_p2 = scmp.lt.s32.totalorder %s50_s30, %s50_s30 }
  0x27   :  { %p569_p1 = scmp.ne.s32.totalorder %s50_s30, %s568_s13  ;;  %p574_p3 = scmp.lt.s32.totalorder %s568_s13, %s568_s13 }
  0x29   :  { %p575_p4 = por %p574_p3, %p573_p2 }
  0x2b   :  { %p576_p5 = pnand %p575_p4, %p569_p1 }
  0x2d   :  { %579 = shalt.err (!%p576_p5)
}
  0x2e   :  { %55 = dma.hbm_to_vmem [thread:$0]  %s764_s3, 256, %s50_s30, [#allocation7], %s643_s16, %s643_s16, %s644_s17  }
  0x2f   :  { %s92_s18 = sshll.u32 %s770_s9, 4  ;;  %s588_s19 = scalar_lea.vmem %s78_s12, 256  ;;  %s93_s18 = int_to_ptr.vmem [resolvable:$true] %s92_s18 }
  0x30   :  { %p589_p6 = scmp.ne.s32.totalorder %s78_s12, %s588_s19  ;;  %p593_p7 = scmp.lt.s32.totalorder %s78_s12, %s78_s12 }
  0x31   :  { %p594_p8 = scmp.lt.s32.totalorder %s588_s19, %s588_s19 }
  0x33   :  { %p595_p9 = por %p594_p8, %p593_p7 }
  0x35   :  { %p596_p10 = pnand %p595_p9, %p589_p6 }
  0x37   :  { %599 = shalt.err (!%p596_p10)
}
  0x38   :  { %83 = dma.hbm_to_vmem [thread:$0]  %s768_s7, 256, %s78_s12, [#allocation10], %s643_s16, %s643_s16, %s644_s17  }
  0x39   :  { %s600_s3 = scalar_lea.vmem %s93_s18, 16  ;;  %p605_p12 = scmp.lt.s32.totalorder %s93_s18, %s93_s18 }
  0x3a   :  { %p601_p11 = scmp.ne.s32.totalorder %s93_s18, %s600_s3  ;;  %p606_p13 = scmp.lt.s32.totalorder %s600_s3, %s600_s3 }
  0x3c   :  { %p607_p0 = por %p606_p13, %p605_p12 }
  0x3e   :  { %p608_p1 = pnand %p607_p0, %p601_p11 }
  0x40   :  { %611 = shalt.err (!%p608_p1)
}
  0x41   :  { %s649_s9 = smov [#allocation12]  }
  0x42   :  { %95 = dma.vmem_to_smem %s93_s18, 16, %s649_s9, [#allocation5]  }
  0x43   :  { %632 = dma.done.wait [#allocation3], 128  }
  0x44   :  { %633 = vsyncadd [#allocation3], 4294967168 }
  0x45   :  { %634 = dma.done.wait [#allocation7], 512  }
  0x46   :  { %635 = vsyncadd [#allocation7], 4294966784 }
  0x47   :  { %636 = dma.done.wait [#allocation10], 512  }
  0x48   :  { %637 = vsyncadd [#allocation10], 4294966784 }
  0x49   :  { %638 = dma.done.wait [#allocation5], 16  }
  0x4a   :  { %639 = vsyncadd [#allocation5], 4294967280 }
  0x4b   :  { %114 = sfence }
  0x4c   :  { %v492_v0 = vld [vmem:[#allocation6 + $0x8] sm:$0xff]   ;;  %v650_v1 = vmov 0.0   ;;  %v493_v2 = vld [vmem:[#allocation6] sm:$0xff]   ;;  %vm651_vm0 = vmmov 0   ;;  %v116_v3 = vld [vmem:[#allocation2] sm:$0xff]  ;;  %vm141_vm1 = vcmask 261120  }
  0x4d   :  { %449 = vmatprep.subr.bf16.mxu0 %v650_v1  ;;  %457 = vmatprep.subr.bf16.mxu1 %v650_v1  ;;  %v117_v4 = vpack.c.bf16 %v116_v3, %v116_v3  ;;  %v494_v5 = vld [vmem:[#allocation9 + $0x8] sm:$0xff]   ;;  %v495_v6 = vld [vmem:[#allocation9] sm:$0xff]   ;;  %v496_v7 = vld [vmem:[#allocation8 + $0x8] sm:$0xff]   ;;  %s248_s7 = sld [smem:[#allocation12]]  ;;  %s652_s27 = smov [#allocation13]   ;;  %vm399_vm5 = vcmask 257024  }
  0x4e   :  { %450 = vmatpush3.bf16.msra.mxu0 %v492_v0  ;;  %453 = vmatprep.mubr.msk.bf16.mxu0 %vm651_vm0, %v650_v1  ;;  %v497_v8 = vld [vmem:[#allocation8] sm:$0xff]   ;;  %v419_v9 = vld [vmem:[%s763_s2] ss:$0 sm:$0xff]  ;;  %s431_s2 = sld [smem:[#allocation12 + $0x1]]  ;;  %s407_s28 = sshll.u32 %s652_s27, 4  ;;  %s408_s28 = int_to_ptr.vmem [resolvable:$true] %s407_s28 }
  0x4f   :  { %451 = vmatprep.subr.bf16.mxu0 %v650_v1  ;;  %461 = vmatprep.mubr.msk.bf16.mxu1 %vm651_vm0, %v650_v1  ;;  %v498_v19 = vld [vmem:[#allocation11 + $0x8] sm:$0xff]   ;;  %v499_v20 = vld [vmem:[#allocation11] sm:$0xff]   ;;  %s436_s24 = sld [smem:[#allocation12 + $0x2]]  ;;  %p617_p3 = scmp.lt.s32.totalorder %s408_s28, %s408_s28 }
  0x50   :  { %458 = vmatpush3.bf16.msra.mxu1 %v496_v7  ;;  %v427_v25 = vld [vmem:[%s767_s6] ss:$0 sm:$0xff] }
  0x51   :  { %459 = vmatprep.subr.bf16.mxu1 %v650_v1  ;;  %v432_v35 = vld [vmem:[%s769_s8] ss:$0 sm:$0xff]  ;;  %s612_s8 = scalar_lea.vmem %s408_s28, 64 }
  0x52   :  { %452 = vmatpush3.bf16.msra.mxu0 %v493_v2  ;;  %v423_v38 = vld [vmem:[%s765_s4] ss:$0 sm:$0xff]  ;;  %p613_p2 = scmp.ne.s32.totalorder %s408_s28, %s612_s8  ;;  %p618_p4 = scmp.lt.s32.totalorder %s612_s8, %s612_s8 }
  0x53   :  { %465 = vmatprep.subr.bf16.mxu0 %v650_v1  ;;  %v250_v11 = vstv %s248_s7 }
  0x54   :  { %460 = vmatpush3.bf16.msra.mxu1 %v497_v8  ;;  %v322_v27 = vstv %s431_s2  ;;  %p619_p5 = por %p618_p4, %p617_p3 }
  0x55   :  { %454 = vmatmul.mubr.msk.bf16.vlgmr.msra.gmra.mxu0 %vm141_vm1, %v117_v4  ;;  %473 = vmatprep.subr.bf16.mxu1 %v650_v1  ;;  %v394_v37 = vstv %s436_s24 }
  0x56   :  { %469 = vmatprep.mubr.msk.bf16.mxu0 %vm651_vm0, %v650_v1  ;;  %466 = vmatpush3.bf16.msra.mxu0 %v494_v5  ;;  %p620_p6 = pnand %p619_p5, %p613_p2 }
  0x57   :  { %467 = vmatprep.subr.bf16.mxu0 %v650_v1  ;;  %462 = vmatmul.mubr.msk.bf16.vlgmr.msra.gmra.mxu1 %vm141_vm1, %v117_v4 }
  0x58   :  { %477 = vmatprep.mubr.msk.bf16.mxu1 %vm651_vm0, %v650_v1  ;;  %474 = vmatpush3.bf16.msra.mxu1 %v498_v19 }
  0x59   :  { %475 = vmatprep.subr.bf16.mxu1 %v650_v1 }
  0x5a   :  { %468 = vmatpush3.bf16.msra.mxu0 %v495_v6 }
  0x5c   :  { %476 = vmatpush3.bf16.msra.mxu1 %v499_v20 }
 0x115   :  { %v179_v10 = vpop.f32.mrf.mxu0 }
 0x116   :  { %v180_v12 = vadd.f32 %v419_v9, %v179_v10 }
 0x117   :  { %v455_v13 = vpop.f32.mrf.mxu0  ;;  %v242_v21 = vpop.f32.mrf.mxu1 }
 0x118   :  { %vm249_vm2 = vcmp.ge.f32.partialorder %v180_v12, 0.0  ;;  %v251_v14 = vmul.f32 %v250_v11, %v180_v12  ;;  %v243_v42 = vadd.f32 %v423_v38, %v242_v21 }
 0x119   :  { %v182_v15 = vpop.f32.mrf.mxu0  ;;  %v463_v22 = vpop.f32.mrf.mxu1 }
 0x11a   :  { %v252_v16 = vsel %vm249_vm2, %v180_v12, %v251_v14 }
 0x11b   :  { %v253_v17 = vpack.c.bf16 %v252_v16, %v252_v16  ;;  %v456_v18 = vpop.f32.mrf.mxu0  ;;  %v245_v23 = vpop.f32.mrf.mxu1 }
 0x11d   :  { %470 = vmatmul.mubr.msk.bf16.vlgmr.msra.gmra.mxu0 %vm141_vm1, %v253_v17  ;;  %v464_v24 = vpop.f32.mrf.mxu1 }
 0x1dd   :  { %v314_v26 = vpop.f32.mrf.mxu0 }
 0x1de   :  { %v315_v28 = vadd.f32 %v427_v25, %v314_v26 }
 0x1df   :  { %v471_v29 = vpop.f32.mrf.mxu0 }
 0x1e0   :  { %vm321_vm3 = vcmp.ge.f32.partialorder %v315_v28, 0.0  ;;  %v323_v30 = vmul.f32 %v322_v27, %v315_v28 }
 0x1e1   :  { %v317_v31 = vpop.f32.mrf.mxu0 }
 0x1e2   :  { %v324_v32 = vsel %vm321_vm3, %v315_v28, %v323_v30 }
 0x1e3   :  { %v325_v33 = vpack.c.bf16 %v324_v32, %v324_v32  ;;  %v472_v34 = vpop.f32.mrf.mxu0 }
 0x1e5   :  { %478 = vmatmul.mubr.msk.bf16.vlgmr.msra.gmra.mxu1 %vm141_vm1, %v325_v33 }
 0x2a5   :  { %v386_v36 = vpop.f32.mrf.mxu1 }
 0x2a6   :  { %v387_v39 = vadd.f32 %v432_v35, %v386_v36 }
 0x2a7   :  { %v479_v40 = vpop.f32.mrf.mxu1 }
 0x2a8   :  { %vm393_vm4 = vcmp.ge.f32.partialorder %v387_v39, 0.0  ;;  %v395_v41 = vmul.f32 %v394_v37, %v387_v39 }
 0x2a9   :  { %v389_v43 = vpop.f32.mrf.mxu1 }
 0x2aa   :  { %v396_v44 = vsel %vm393_vm4, %v387_v39, %v395_v41 }
 0x2ab   :  { %v480_v45 = vpop.f32.mrf.mxu1  ;;  %v397_v46 = vadd.f32 %v396_v44, %v243_v42 }
 0x2ad   :  { %v398_v47 = vpack.c.bf16 %v397_v46, %v397_v46 }
 0x2af   :  { %400 = vst.msk [vmem:[#allocation13] sm:$0xf] %vm399_vm5, %v398_v47 }
 0x2b0   :  { %623 = shalt.err (!%p620_p6)
}
 0x2b1   :  { %410 = dma.vmem_to_hbm [thread:$0]  %s408_s28, 64, %s771_s10, [#allocation4]  }
 0x2b2   :  { %640 = dma.done.wait [#allocation4], 64  }
 0x2b3   :  { %641 = vsyncadd [#allocation4], 4294967232 }
 0x2b4   :  { %414 = vsyncpa [#allocation3], 1 }
 0x2b5   :  { %415 = vsyncpa [#allocation7], 1 }
 0x2b6   :  { %416 = vsyncpa [#allocation10], 1 }
 0x2b7   :  { %417 = vsyncpa [#allocation4], 1 }
 0x2b8   :  { %418 = vsyncpa [#allocation5], 1 }

// kernel: tpu_custom_call.1
= control target key start
LH: loop header
LB: loop body
LE: loop exit
PB: predicated region body
PF: predicated region fallthrough
CT: control target
= control target key end

     0   :  { %15 = vsyncpa [#allocation3], 0  ;;  %s761_s0 = inlined_call_operand.hbm [shape: f32[8,32], index: 0, kind: input, shape index: {}]   ;;  %s762_s1 = inlined_call_operand.hbm [shape: bf16[32,32], index: 1, kind: input, shape index: {}]   ;;  %s763_s2 = inlined_call_operand.vmem [shape: f32[1,32], index: 2, kind: input, shape index: {}]   ;;  %s764_s3 = inlined_call_operand.hbm [shape: bf16[32,32], index: 3, kind: input, shape index: {}]   ;;  %s765_s4 = inlined_call_operand.vmem [shape: f32[1,32], index: 4, kind: input, shape index: {}]   ;;  %s766_s5 = inlined_call_operand.hbm [shape: bf16[32,32], index: 5, kind: input, shape index: {}]   ;;  %s767_s6 = inlined_call_operand.vmem [shape: f32[1,32], index: 6, kind: input, shape index: {}]   ;;  %s768_s7 = inlined_call_operand.hbm [shape: bf16[32,32], index: 7, kind: input, shape index: {}]   ;;  %s769_s8 = inlined_call_operand.vmem [shape: f32[1,32], index: 8, kind: input, shape index: {}]   ;;  %s770_s9 = inlined_call_operand.vmem [shape: f32[3], index: 9, kind: input, shape index: {}]   ;;  %s771_s10 = inlined_call_operand.hbm [shape: bf16[8,32], index: 10, kind: output, shape index: {}]  }
   0x1   :  { %16 = vsyncpa [#allocation7], 0 }
   0x2   :  { %17 = vsyncpa [#allocation10], 0 }
   0x3   :  { %18 = vsyncpa [#allocation5], 0 }
   0x4   :  { %19 = vsyncpa [#allocation4], 0  ;;  %s642_s13 = smov [#allocation6]  }
   0x5   :  { %s35_s14 = sshll.u32 %s642_s13, 4  ;;  %s36_s14 = int_to_ptr.vmem [resolvable:$true] %s35_s14 }
   0x6   :  { %s508_s15 = scalar_lea.vmem %s36_s14, 256  ;;  %p513_p1 = scmp.lt.s32.totalorder %s36_s14, %s36_s14 }
   0x7   :  { %p509_p0 = scmp.ne.s32.totalorder %s36_s14, %s508_s15  ;;  %p514_p2 = scmp.lt.s32.totalorder %s508_s15, %s508_s15 }
   0x9   :  { %p515_p3 = por %p514_p2, %p513_p1 }
   0xb   :  { %p516_p4 = pnand %p515_p3, %p509_p0 }
   0xd   :  { %519 = shalt.err (!%p516_p4)
}
   0xe   :  { %s643_s16 = smov 64   ;;  %s644_s17 = smov 4  }
   0xf   :  { %41 = dma.hbm_to_vmem [thread:$0]  %s762_s1, 256, %s36_s14, [#allocation7], %s643_s16, %s643_s16, %s644_s17  }
  0x10   :  { %s645_s20 = smov [#allocation9]   ;;  %s646_s22 = smov [#allocation2]  }
  0x11   :  { %s63_s21 = sshll.u32 %s645_s20, 4  ;;  %s26_s23 = sshll.u32 %s646_s22, 4  ;;  %s64_s21 = int_to_ptr.vmem [resolvable:$true] %s63_s21  ;;  %s27_s23 = int_to_ptr.vmem [resolvable:$true] %s26_s23 }
  0x12   :  { %s528_s24 = scalar_lea.vmem %s64_s21, 256  ;;  %p533_p6 = scmp.lt.s32.totalorder %s64_s21, %s64_s21 }
  0x13   :  { %p529_p5 = scmp.ne.s32.totalorder %s64_s21, %s528_s24  ;;  %p534_p7 = scmp.lt.s32.totalorder %s528_s24, %s528_s24 }
  0x15   :  { %p535_p8 = por %p534_p7, %p533_p6 }
  0x17   :  { %p536_p9 = pnand %p535_p8, %p529_p5 }
  0x19   :  { %539 = shalt.err (!%p536_p9)
}
  0x1a   :  { %69 = dma.hbm_to_vmem [thread:$0]  %s766_s5, 256, %s64_s21, [#allocation10], %s643_s16, %s643_s16, %s644_s17  }
  0x1b   :  { %s548_s1 = scalar_lea.vmem %s27_s23, 128  ;;  %p553_p11 = scmp.lt.s32.totalorder %s27_s23, %s27_s23 }
  0x1c   :  { %p549_p10 = scmp.ne.s32.totalorder %s27_s23, %s548_s1  ;;  %p554_p12 = scmp.lt.s32.totalorder %s548_s1, %s548_s1 }
  0x1e   :  { %p555_p13 = por %p554_p12, %p553_p11 }
  0x20   :  { %p556_p0 = pnand %p555_p13, %p549_p10 }
  0x22   :  { %559 = shalt.err (!%p556_p0)
}
  0x23   :  { %29 = dma.hbm_to_vmem [thread:$0]  %s761_s0, 128, %s27_s23, [#allocation3]  }
  0x24   :  { %s647_s29 = smov [#allocation8]   ;;  %s648_s11 = smov [#allocation11]  }
  0x25   :  { %s49_s30 = sshll.u32 %s647_s29, 4  ;;  %s77_s12 = sshll.u32 %s648_s11, 4  ;;  %s50_s30 = int_to_ptr.vmem [resolvable:$true] %s49_s30  ;;  %s78_s12 = int_to_ptr.vmem [resolvable:$true] %s77_s12 }
  0x26   :  { %s568_s13 = scalar_lea.vmem %s50_s30, 256  ;;  %p573_p2 = scmp.lt.s32.totalorder %s50_s30, %s50_s30 }
  0x27   :  { %p569_p1 = scmp.ne.s32.totalorder %s50_s30, %s568_s13  ;;  %p574_p3 = scmp.lt.s32.totalorder %s568_s13, %s568_s13 }
  0x29   :  { %p575_p4 = por %p574_p3, %p573_p2 }
  0x2b   :  { %p576_p5 = pnand %p575_p4, %p569_p1 }
  0x2d   :  { %579 = shalt.err (!%p576_p5)
}
  0x2e   :  { %55 = dma.hbm_to_vmem [thread:$0]  %s764_s3, 256, %s50_s30, [#allocation7], %s643_s16, %s643_s16, %s644_s17  }
  0x2f   :  { %s92_s18 = sshll.u32 %s770_s9, 4  ;;  %s588_s19 = scalar_lea.vmem %s78_s12, 256  ;;  %s93_s18 = int_to_ptr.vmem [resolvable:$true] %s92_s18 }
  0x30   :  { %p589_p6 = scmp.ne.s32.totalorder %s78_s12, %s588_s19  ;;  %p593_p7 = scmp.lt.s32.totalorder %s78_s12, %s78_s12 }
  0x31   :  { %p594_p8 = scmp.lt.s32.totalorder %s588_s19, %s588_s19 }
  0x33   :  { %p595_p9 = por %p594_p8, %p593_p7 }
  0x35   :  { %p596_p10 = pnand %p595_p9, %p589_p6 }
  0x37   :  { %599 = shalt.err (!%p596_p10)
}
  0x38   :  { %83 = dma.hbm_to_vmem [thread:$0]  %s768_s7, 256, %s78_s12, [#allocation10], %s643_s16, %s643_s16, %s644_s17  }
  0x39   :  { %s600_s3 = scalar_lea.vmem %s93_s18, 16  ;;  %p605_p12 = scmp.lt.s32.totalorder %s93_s18, %s93_s18 }
  0x3a   :  { %p601_p11 = scmp.ne.s32.totalorder %s93_s18, %s600_s3  ;;  %p606_p13 = scmp.lt.s32.totalorder %s600_s3, %s600_s3 }
  0x3c   :  { %p607_p0 = por %p606_p13, %p605_p12 }
  0x3e   :  { %p608_p1 = pnand %p607_p0, %p601_p11 }
  0x40   :  { %611 = shalt.err (!%p608_p1)
}
  0x41   :  { %s649_s9 = smov [#allocation12]  }
  0x42   :  { %95 = dma.vmem_to_smem %s93_s18, 16, %s649_s9, [#allocation5]  }
  0x43   :  { %632 = dma.done.wait [#allocation3], 128  }
  0x44   :  { %633 = vsyncadd [#allocation3], 4294967168 }
  0x45   :  { %634 = dma.done.wait [#allocation7], 512  }
  0x46   :  { %635 = vsyncadd [#allocation7], 4294966784 }
  0x47   :  { %636 = dma.done.wait [#allocation10], 512  }
  0x48   :  { %637 = vsyncadd [#allocation10], 4294966784 }
  0x49   :  { %638 = dma.done.wait [#allocation5], 16  }
  0x4a   :  { %639 = vsyncadd [#allocation5], 4294967280 }
  0x4b   :  { %114 = sfence }
  0x4c   :  { %v492_v0 = vld [vmem:[#allocation6 + $0x8] sm:$0xff]   ;;  %v650_v1 = vmov 0.0   ;;  %v493_v2 = vld [vmem:[#allocation6] sm:$0xff]   ;;  %vm651_vm0 = vmmov 0   ;;  %v116_v3 = vld [vmem:[#allocation2] sm:$0xff]  ;;  %vm141_vm1 = vcmask 261120  }
  0x4d   :  { %449 = vmatprep.subr.bf16.mxu0 %v650_v1  ;;  %457 = vmatprep.subr.bf16.mxu1 %v650_v1  ;;  %v117_v4 = vpack.c.bf16 %v116_v3, %v116_v3  ;;  %v494_v5 = vld [vmem:[#allocation9 + $0x8] sm:$0xff]   ;;  %v495_v6 = vld [vmem:[#allocation9] sm:$0xff]   ;;  %v496_v7 = vld [vmem:[#allocation8 + $0x8] sm:$0xff]   ;;  %s248_s7 = sld [smem:[#allocation12]]  ;;  %s652_s27 = smov [#allocation13]   ;;  %vm399_vm5 = vcmask 257024  }
  0x4e   :  { %450 = vmatpush3.bf16.msra.mxu0 %v492_v0  ;;  %453 = vmatprep.mubr.msk.bf16.mxu0 %vm651_vm0, %v650_v1  ;;  %v497_v8 = vld [vmem:[#allocation8] sm:$0xff]   ;;  %v419_v9 = vld [vmem:[%s763_s2] ss:$0 sm:$0xff]  ;;  %s431_s2 = sld [smem:[#allocation12 + $0x1]]  ;;  %s407_s28 = sshll.u32 %s652_s27, 4  ;;  %s408_s28 = int_to_ptr.vmem [resolvable:$true] %s407_s28 }
  0x4f   :  { %451 = vmatprep.subr.bf16.mxu0 %v650_v1  ;;  %461 = vmatprep.mubr.msk.bf16.mxu1 %vm651_vm0, %v650_v1  ;;  %v498_v19 = vld [vmem:[#allocation11 + $0x8] sm:$0xff]   ;;  %v499_v20 = vld [vmem:[#allocation11] sm:$0xff]   ;;  %s436_s24 = sld [smem:[#allocation12 + $0x2]]  ;;  %p617_p3 = scmp.lt.s32.totalorder %s408_s28, %s408_s28 }
  0x50   :  { %458 = vmatpush3.bf16.msra.mxu1 %v496_v7  ;;  %v427_v25 = vld [vmem:[%s767_s6] ss:$0 sm:$0xff] }
  0x51   :  { %459 = vmatprep.subr.bf16.mxu1 %v650_v1  ;;  %v432_v35 = vld [vmem:[%s769_s8] ss:$0 sm:$0xff]  ;;  %s612_s8 = scalar_lea.vmem %s408_s28, 64 }
  0x52   :  { %452 = vmatpush3.bf16.msra.mxu0 %v493_v2  ;;  %v423_v38 = vld [vmem:[%s765_s4] ss:$0 sm:$0xff]  ;;  %p613_p2 = scmp.ne.s32.totalorder %s408_s28, %s612_s8  ;;  %p618_p4 = scmp.lt.s32.totalorder %s612_s8, %s612_s8 }
  0x53   :  { %465 = vmatprep.subr.bf16.mxu0 %v650_v1  ;;  %v250_v11 = vstv %s248_s7 }
  0x54   :  { %460 = vmatpush3.bf16.msra.mxu1 %v497_v8  ;;  %v322_v27 = vstv %s431_s2  ;;  %p619_p5 = por %p618_p4, %p617_p3 }
  0x55   :  { %454 = vmatmul.mubr.msk.bf16.vlgmr.msra.gmra.mxu0 %vm141_vm1, %v117_v4  ;;  %473 = vmatprep.subr.bf16.mxu1 %v650_v1  ;;  %v394_v37 = vstv %s436_s24 }
  0x56   :  { %469 = vmatprep.mubr.msk.bf16.mxu0 %vm651_vm0, %v650_v1  ;;  %466 = vmatpush3.bf16.msra.mxu0 %v494_v5  ;;  %p620_p6 = pnand %p619_p5, %p613_p2 }
  0x57   :  { %467 = vmatprep.subr.bf16.mxu0 %v650_v1  ;;  %462 = vmatmul.mubr.msk.bf16.vlgmr.msra.gmra.mxu1 %vm141_vm1, %v117_v4 }
  0x58   :  { %477 = vmatprep.mubr.msk.bf16.mxu1 %vm651_vm0, %v650_v1  ;;  %474 = vmatpush3.bf16.msra.mxu1 %v498_v19 }
  0x59   :  { %475 = vmatprep.subr.bf16.mxu1 %v650_v1 }
  0x5a   :  { %468 = vmatpush3.bf16.msra.mxu0 %v495_v6 }
  0x5c   :  { %476 = vmatpush3.bf16.msra.mxu1 %v499_v20 }
 0x115   :  { %v179_v10 = vpop.f32.mrf.mxu0 }
 0x116   :  { %v180_v12 = vadd.f32 %v419_v9, %v179_v10 }
 0x117   :  { %v455_v13 = vpop.f32.mrf.mxu0  ;;  %v242_v21 = vpop.f32.mrf.mxu1 }
 0x118   :  { %vm249_vm2 = vcmp.ge.f32.partialorder %v180_v12, 0.0  ;;  %v251_v14 = vmul.f32 %v250_v11, %v180_v12  ;;  %v243_v42 = vadd.f32 %v423_v38, %v242_v21 }
 0x119   :  { %v182_v15 = vpop.f32.mrf.mxu0  ;;  %v463_v22 = vpop.f32.mrf.mxu1 }
 0x11a   :  { %v252_v16 = vsel %vm249_vm2, %v180_v12, %v251_v14 }
 0x11b   :  { %v253_v17 = vpack.c.bf16 %v252_v16, %v252_v16  ;;  %v456_v18 = vpop.f32.mrf.mxu0  ;;  %v245_v23 = vpop.f32.mrf.mxu1 }
 0x11d   :  { %470 = vmatmul.mubr.msk.bf16.vlgmr.msra.gmra.mxu0 %vm141_vm1, %v253_v17  ;;  %v464_v24 = vpop.f32.mrf.mxu1 }
 0x1dd   :  { %v314_v26 = vpop.f32.mrf.mxu0 }
 0x1de   :  { %v315_v28 = vadd.f32 %v427_v25, %v314_v26 }
 0x1df   :  { %v471_v29 = vpop.f32.mrf.mxu0 }
 0x1e0   :  { %vm321_vm3 = vcmp.ge.f32.partialorder %v315_v28, 0.0  ;;  %v323_v30 = vmul.f32 %v322_v27, %v315_v28 }
 0x1e1   :  { %v317_v31 = vpop.f32.mrf.mxu0 }
 0x1e2   :  { %v324_v32 = vsel %vm321_vm3, %v315_v28, %v323_v30 }
 0x1e3   :  { %v325_v33 = vpack.c.bf16 %v324_v32, %v324_v32  ;;  %v472_v34 = vpop.f32.mrf.mxu0 }
 0x1e5   :  { %478 = vmatmul.mubr.msk.bf16.vlgmr.msra.gmra.mxu1 %vm141_vm1, %v325_v33 }
 0x2a5   :  { %v386_v36 = vpop.f32.mrf.mxu1 }
 0x2a6   :  { %v387_v39 = vadd.f32 %v432_v35, %v386_v36 }
 0x2a7   :  { %v479_v40 = vpop.f32.mrf.mxu1 }
 0x2a8   :  { %vm393_vm4 = vcmp.ge.f32.partialorder %v387_v39, 0.0  ;;  %v395_v41 = vmul.f32 %v394_v37, %v387_v39 }
 0x2a9   :  { %v389_v43 = vpop.f32.mrf.mxu1 }
 0x2aa   :  { %v396_v44 = vsel %vm393_vm4, %v387_v39, %v395_v41 }
 0x2ab   :  { %v480_v45 = vpop.f32.mrf.mxu1  ;;  %v397_v46 = vadd.f32 %v396_v44, %v243_v42 }
 0x2ad   :  { %v398_v47 = vpack.c.bf16 %v397_v46, %v397_v46 }
 0x2af   :  { %400 = vst.msk [vmem:[#allocation13] sm:$0xf] %vm399_vm5, %v398_v47 }
 0x2b0   :  { %623 = shalt.err (!%p620_p6)
}
 0x2b1   :  { %410 = dma.vmem_to_hbm [thread:$0]  %s408_s28, 64, %s771_s10, [#allocation4]  }
 0x2b2   :  { %640 = dma.done.wait [#allocation4], 64  }
 0x2b3   :  { %641 = vsyncadd [#allocation4], 4294967232 }
 0x2b4   :  { %414 = vsyncpa [#allocation3], 1 }
 0x2b5   :  { %415 = vsyncpa [#allocation7], 1 }
 0x2b6   :  { %416 = vsyncpa [#allocation10], 1 }
 0x2b7   :  { %417 = vsyncpa [#allocation4], 1 }
 0x2b8   :  { %418 = vsyncpa [#allocation5], 1 }

</bundles_post_ra>
